<compile_context>
chip_gen: v6e
topology: v6e:2x2x1
jax: 0.10.0
libtpu: 0.0.40
codegen_flags: <defaults>
</compile_context>

<pallas_src>
import jax
import jax.numpy as jnp
from jax.experimental import pallas as pl
from jax.experimental.pallas import tpu as pltpu


def _rup(x, m):
    return ((x + m - 1) // m) * m


def _action_predictor_kernel(x_ref, pc_ref, ww_ref, wo_ref, bo_ref, out_ref):
    # h = word_vec @ W_word + (pos_contrib + b_word + b_pos)  (bias pre-fused into pc)
    h = jnp.dot(x_ref[...], ww_ref[...], preferred_element_type=jnp.float32)
    h = h + pc_ref[...].astype(jnp.float32)
    y = jnp.maximum(h, 0.0)                                   # ReLU (VPU)
    out = jnp.dot(y.astype(wo_ref.dtype), wo_ref[...],
                  preferred_element_type=jnp.float32)
    out_ref[...] = (out + bo_ref[...].astype(jnp.float32)).astype(out_ref.dtype)


def prepare_params(params, seq_len, compute_dtype=jnp.bfloat16):
    """One-time, per-parameter-set preprocessing (hoisted out of the hot path)."""
    L = jnp.float32(seq_len)
    emb = params["pos_embeddings"].astype(jnp.float32)        # (V, P)
    W_pos = params["W_pos"].astype(jnp.float32)               # (P, H)
    emb_proj = emb @ (W_pos / L)                              # (V, H): mean folded in
    bias_h = (params["b_word"] + params["b_pos"]).astype(jnp.float32)   # (1, H)
    return {
        "emb_proj": emb_proj,                                 # kept f32 (tiny)
        "bias_h": bias_h,
        "W_word": params["W_word"].astype(compute_dtype),     # (E, H)
        "W_out": params["W_out"].astype(compute_dtype),       # (H, O)
        "b_out": params["b_out"].astype(jnp.float32),         # (1, O)
    }


def _choose_batch_tile(B, tb):
    """Batch tile (multiple of 8, or == B when B <= 8) and number of grid steps."""
    if B <= 8:
        return B, 1                       # single block, block dim == full array dim
    tb = max(8, (int(tb) // 8) * 8)       # force multiple of 8
    n_steps = pl.cdiv(B, tb)
    if n_steps < 2 and B >= 16:
        n_steps = 2                       # give both v7x TensorCores work
    TB = _rup(pl.cdiv(B, n_steps), 8)
    n_steps = pl.cdiv(B, TB)              # last block may be partial (Pallas masks it)
    return TB, n_steps


def action_predictor_forward(word_vec, pos_vec, prepared, *, tb=2048,
                             out_dtype=jnp.float32):
    """word_vec: (B, E) f32, pos_vec: (B, L) int32 -> (B, O) out_dtype."""
    B, E = word_vec.shape
    H = prepared["emb_proj"].shape[1]
    O = prepared["W_out"].shape[1]
    cdt = prepared["W_word"].dtype

    # Tiny XLA glue: gather the pre-projected POS rows, sum over L, fuse hidden bias.
    pos_contrib = (jnp.take(prepared["emb_proj"], pos_vec, axis=0).sum(axis=1)
                   + prepared["bias_h"]).astype(cdt)          # (B, H)
    x = word_vec.astype(cdt)                                  # (B, E)

    TB, n_steps = _choose_batch_tile(B, tb)

    isz = jnp.dtype(cdt).itemsize
    cost = pl.CostEstimate(
        flops=2 * B * (E * H + H * O),
        transcendentals=0,
        bytes_accessed=(B * (E + H) * isz
                        + B * O * jnp.dtype(out_dtype).itemsize
                        + (E * H + H * O) * isz + O * 4),
    )

    return pl.pallas_call(
        _action_predictor_kernel,
        out_shape=jax.ShapeDtypeStruct((B, O), out_dtype),
        grid=(n_steps,),
        in_specs=[
            pl.BlockSpec((TB, E), lambda i: (i, 0)),          # word_vec (streamed)
            pl.BlockSpec((TB, H), lambda i: (i, 0)),          # pos contrib + fused bias
            pl.BlockSpec((E, H), lambda i: (0, 0)),           # W_word (VMEM resident)
            pl.BlockSpec((H, O), lambda i: (0, 0)),           # W_out  (VMEM resident)
            pl.BlockSpec((1, O), lambda i: (0, 0)),           # b_out  (VMEM resident)
        ],
        out_specs=pl.BlockSpec((TB, O), lambda i: (i, 0)),
        compiler_params=pltpu.CompilerParams(
            dimension_semantics=("parallel",)),               # batch shards across TCs
        cost_estimate=cost,
    )(x, pos_contrib, prepared["W_word"], prepared["W_out"], prepared["b_out"])


def init_params(key, embedding_dim, pos_dim, hidden_dim, out_dim, pos_dict_len):
    ks = jax.random.split(key, 7)
    scale = 0.1
    return {
        "pos_embeddings": scale * jax.random.normal(ks[0], (pos_dict_len, pos_dim), jnp.float32),
        # weights stored as (in_dim, out_dim) so the kernel computes x @ W
        "W_word": scale * jax.random.normal(ks[1], (embedding_dim, hidden_dim), jnp.float32),
        "b_word": scale * jax.random.normal(ks[2], (1, hidden_dim), jnp.float32),
        "W_pos":  scale * jax.random.normal(ks[3], (pos_dim, hidden_dim), jnp.float32),
        "b_pos":  scale * jax.random.normal(ks[4], (1, hidden_dim), jnp.float32),
        "W_out":  scale * jax.random.normal(ks[5], (hidden_dim, out_dim), jnp.float32),
        "b_out":  scale * jax.random.normal(ks[6], (1, out_dim), jnp.float32),
    }


def _reference(word_vec, pos_vec, params):
    pos = params["pos_embeddings"][pos_vec].mean(axis=1)
    h = word_vec @ params["W_word"] + params["b_word"] \
        + pos @ params["W_pos"] + params["b_pos"]
    y = jnp.maximum(h, 0.0)
    return y @ params["W_out"] + params["b_out"]


if __name__ == "__main__":
    # small shapes consistent with the module
    B, L = 8, 4                      # batch, POS-sequence length
    embedding_dim, pos_dim = 32, 16
    hidden_dim, out_dim = 32, 8
    pos_dict_len = 20

    key = jax.random.PRNGKey(0)
    kp, kw, ki, kw2, ki2 = jax.random.split(key, 5)

    params = init_params(kp, embedding_dim, pos_dim, hidden_dim, out_dim, pos_dict_len)
    word_vec = jax.random.normal(kw, (B, embedding_dim), jnp.float32)
    pos_vec = jax.random.randint(ki, (B, L), 0, pos_dict_len, jnp.int32)
    ref = _reference(word_vec, pos_vec, params)

    # exact-parity f32 path
    prep32 = prepare_params(params, L, compute_dtype=jnp.float32)
    out32 = action_predictor_forward(word_vec, pos_vec, prep32)
    jax.block_until_ready(out32)
    assert out32.shape == (B, out_dim)
    assert jnp.allclose(out32, ref, atol=1e-4, rtol=1e-4), "f32 path mismatch vs reference"

    # bf16-streamed path (default for bandwidth-bound deployment)
    prep16 = prepare_params(params, L, compute_dtype=jnp.bfloat16)
    out16 = action_predictor_forward(word_vec, pos_vec, prep16)
    jax.block_until_ready(out16)
    assert out16.shape == (B, out_dim)
    assert jnp.allclose(out16, ref, atol=5e-2, rtol=5e-2), "bf16 path mismatch vs reference"

    # larger, non-tile-aligned batch exercising the multi-step pipelined grid
    B2 = 200
    word_vec2 = jax.random.normal(kw2, (B2, embedding_dim), jnp.float32)
    pos_vec2 = jax.random.randint(ki2, (B2, L), 0, pos_dict_len, jnp.int32)
    ref2 = _reference(word_vec2, pos_vec2, params)
    out2 = action_predictor_forward(word_vec2, pos_vec2, prep32, tb=64)
    jax.block_until_ready(out2)
    assert out2.shape == (B2, out_dim)
    assert jnp.allclose(out2, ref2, atol=1e-4, rtol=1e-4), "batched f32 path mismatch"

    print("KERNEL_OK")
</pallas_src>

<mosaic_0001>
module attributes {stable_mosaic.version = 11 : i64} {
  func.func @_action_predictor_kernel(%arg0: i32, %arg1: memref<8x32xf32, #tpu.memory_space<vmem>>, %arg2: memref<8x32xf32, #tpu.memory_space<vmem>>, %arg3: memref<32x32xf32, #tpu.memory_space<vmem>>, %arg4: memref<32x8xf32, #tpu.memory_space<vmem>>, %arg5: memref<1x8xf32, #tpu.memory_space<vmem>>, %arg6: memref<8x8xf32, #tpu.memory_space<vmem>>) attributes {dimension_semantics = [#tpu.dimension_semantics<parallel>], iteration_bounds = array<i64: 1>, scalar_prefetch = 0 : i64, scratch_operands = 0 : i64, tpu.core_type = #tpu.core_type<tc>, window_params = [{transform_indices = @transform_0, window_bounds = array<i64: 8, 32>}, {transform_indices = @transform_1, window_bounds = array<i64: 8, 32>}, {pipeline_mode = #tpu.pipeline_mode<synchronous>, transform_indices = @transform_2, window_bounds = array<i64: 32, 32>}, {pipeline_mode = #tpu.pipeline_mode<synchronous>, transform_indices = @transform_3, window_bounds = array<i64: 32, 8>}, {pipeline_mode = #tpu.pipeline_mode<synchronous>, transform_indices = @transform_4, window_bounds = array<i64: 1, 8>}, {transform_indices = @transform_5, window_bounds = array<i64: 8, 8>}]} {
    %c0 = arith.constant 0 : index
    %c0_0 = arith.constant 0 : index
    %0 = vector.load %arg1[%c0, %c0_0] : memref<8x32xf32, #tpu.memory_space<vmem>>, vector<8x32xf32>
    %c0_1 = arith.constant 0 : index
    %c0_2 = arith.constant 0 : index
    %1 = vector.load %arg3[%c0_1, %c0_2] : memref<32x32xf32, #tpu.memory_space<vmem>>, vector<32x32xf32>
    %cst = arith.constant dense<0.000000e+00> : vector<8x32xf32>
    %2 = tpu.matmul %0, %1, %cst {dimension_numbers = #tpu.dot_dimension_numbers<[1], [0], [0], [1], [0, 0, 1, 1], [], []>} : vector<8x32xf32>, vector<32x32xf32>, vector<8x32xf32> -> vector<8x32xf32>
    %c0_3 = arith.constant 0 : index
    %c0_4 = arith.constant 0 : index
    %3 = vector.load %arg2[%c0_3, %c0_4] : memref<8x32xf32, #tpu.memory_space<vmem>>, vector<8x32xf32>
    %4 = arith.addf %2, %3 : vector<8x32xf32>
    %cst_5 = arith.constant 0.000000e+00 : f32
    %5 = vector.broadcast %cst_5 : f32 to vector<8x32xf32>
    %6 = arith.maximumf %4, %5 : vector<8x32xf32>
    %c0_6 = arith.constant 0 : index
    %c0_7 = arith.constant 0 : index
    %7 = vector.load %arg4[%c0_6, %c0_7] : memref<32x8xf32, #tpu.memory_space<vmem>>, vector<32x8xf32>
    %cst_8 = arith.constant dense<0.000000e+00> : vector<8x8xf32>
    %8 = tpu.matmul %6, %7, %cst_8 {dimension_numbers = #tpu.dot_dimension_numbers<[1], [0], [0], [1], [0, 0, 1, 1], [], []>} : vector<8x32xf32>, vector<32x8xf32>, vector<8x8xf32> -> vector<8x8xf32>
    %c0_9 = arith.constant 0 : index
    %c0_10 = arith.constant 0 : index
    %9 = vector.load %arg5[%c0_9, %c0_10] : memref<1x8xf32, #tpu.memory_space<vmem>>, vector<1x8xf32>
    %10 = vector.broadcast %9 : vector<1x8xf32> to vector<8x8xf32>
    %11 = arith.addf %8, %10 : vector<8x8xf32>
    %c0_11 = arith.constant 0 : index
    %c0_12 = arith.constant 0 : index
    %12 = vector.load %arg6[%c0_11, %c0_12] : memref<8x8xf32, #tpu.memory_space<vmem>>, vector<8x8xf32>
    tpu.vector_store %arg6[%c0_11, %c0_12], %11 {strides = array<i32>} : memref<8x8xf32, #tpu.memory_space<vmem>>, vector<8x8xf32>,
    return
  }
  func.func @transform_0(%arg0: i32) -> (i32, i32) {
    %c0_i32 = arith.constant 0 : i32
    %c0_i32_0 = arith.constant 0 : i32
    return %arg0, %c0_i32 : i32, i32
  }
  func.func @transform_1(%arg0: i32) -> (i32, i32) {
    %c0_i32 = arith.constant 0 : i32
    %c0_i32_0 = arith.constant 0 : i32
    return %arg0, %c0_i32 : i32, i32
  }
  func.func @transform_2(%arg0: i32) -> (i32, i32) {
    %c0_i32 = arith.constant 0 : i32
    %c0_i32_0 = arith.constant 0 : i32
    %c0_i32_1 = arith.constant 0 : i32
    return %c0_i32, %c0_i32_0 : i32, i32
  }
  func.func @transform_3(%arg0: i32) -> (i32, i32) {
    %c0_i32 = arith.constant 0 : i32
    %c0_i32_0 = arith.constant 0 : i32
    %c0_i32_1 = arith.constant 0 : i32
    return %c0_i32, %c0_i32_0 : i32, i32
  }
  func.func @transform_4(%arg0: i32) -> (i32, i32) {
    %c0_i32 = arith.constant 0 : i32
    %c0_i32_0 = arith.constant 0 : i32
    %c0_i32_1 = arith.constant 0 : i32
    return %c0_i32, %c0_i32_0 : i32, i32
  }
  func.func @transform_5(%arg0: i32) -> (i32, i32) {
    %c0_i32 = arith.constant 0 : i32
    %c0_i32_0 = arith.constant 0 : i32
    return %arg0, %c0_i32 : i32, i32
  }
}

</mosaic_0001>

<bundles_post_ra>
// kernel: tpu_custom_call.1
= control target key start
LH: loop header
LB: loop body
LE: loop exit
PB: predicated region body
PF: predicated region fallthrough
CT: control target
= control target key end

     0   :  { %10 = vsyncpa [#allocation3], 0  ;;  %s370_s0 = inlined_call_operand.vmem [shape: f32[8,32], index: 0, kind: input, shape index: {}]   ;;  %s371_s1 = inlined_call_operand.hbm [shape: f32[8,32], index: 1, kind: input, shape index: {}]   ;;  %s372_s2 = inlined_call_operand.vmem [shape: f32[32,32], index: 2, kind: input, shape index: {}]   ;;  %s373_s3 = inlined_call_operand.vmem [shape: f32[32,8], index: 3, kind: input, shape index: {}]   ;;  %s374_s4 = inlined_call_operand.vmem [shape: f32[1,8], index: 4, kind: input, shape index: {}]   ;;  %s375_s5 = inlined_call_operand.hbm [shape: f32[8,8], index: 5, kind: output, shape index: {}]  }
   0x1   :  { %11 = vsyncpa [#allocation4], 0  ;;  %s298_s18 = smov [#allocation2]  }
   0x2   :  { %s20_s19 = sshll.u32 %s298_s18, 4  ;;  %s21_s19 = int_to_ptr.vmem [resolvable:$true] %s20_s19 }
   0x3   :  { %s262_s20 = scalar_lea.vmem %s21_s19, 128  ;;  %p267_p1 = scmp.lt.s32.totalorder %s21_s19, %s21_s19 }
   0x4   :  { %p263_p0 = scmp.ne.s32.totalorder %s21_s19, %s262_s20  ;;  %p268_p2 = scmp.lt.s32.totalorder %s262_s20, %s262_s20 }
   0x6   :  { %p269_p3 = por %p268_p2, %p267_p1 }
   0x8   :  { %p270_p4 = pnand %p269_p3, %p263_p0 }
   0xa   :  { %273 = shalt.err (!%p270_p4)
}
   0xb   :  { %23 = dma.hbm_to_vmem [thread:$0]  %s371_s1, 128, %s21_s19, [#allocation3]  }
   0xc   :  { %294 = dma.done.wait [#allocation3], 128  }
   0xd   :  { %295 = vsyncadd [#allocation3], 4294967168  ;;  %v299_v0 = vmov 0.0   ;;  %vm300_vm0 = vmmov 0   ;;  %v37_v1 = vld [vmem:[%s372_s2 + $0x18] sm:$0xff]  ;;  %v36_v2 = vld [vmem:[%s372_s2 + $0x10] sm:$0xff] }
   0xe   :  { %228 = vmatprep.subr.mxu0 %v299_v0  ;;  %236 = vmatprep.mubr.msk.f32.mxu0 %vm300_vm0, %v299_v0  ;;  %v117_v3 = vld [vmem:[%s373_s3 + $0x18] sm:$0xff]  ;;  %v35_v4 = vld [vmem:[%s372_s2 + $0x8] sm:$0xff]  ;;  %v34_v5 = vld [vmem:[%s372_s2] sm:$0xff]  ;;  %vm39_vm1 = vcmask 261120   ;;  %s301_s15 = smov [#allocation5]   ;;  %vm198_vm2 = vcmask 64512  }
   0xf   :  { %239 = vmatprep.subr.mxu1 %v299_v0  ;;  %247 = vmatprep.mubr.msk.f32.mxu1 %vm300_vm0, %v299_v0  ;;  %v33_v6 = vld [vmem:[%s370_s0] sm:$0xff]  ;;  %v116_v7 = vld [vmem:[%s373_s3 + $0x10] sm:$0xff]  ;;  %v115_v8 = vld [vmem:[%s373_s3 + $0x8] sm:$0xff]  ;;  %s206_s16 = sshll.u32 %s301_s15, 4  ;;  %s207_s16 = int_to_ptr.vmem [resolvable:$true] %s206_s16 }
  0x10   :  { %229 = vmatpush3.msra.mxu0 %v37_v1  ;;  %240 = vmatpush3.msra.mxu1 %v117_v3  ;;  %v114_v9 = vld [vmem:[%s373_s3] sm:$0xff]  ;;  %s274_s3 = scalar_lea.vmem %s207_s16, 128  ;;  %p279_p6 = scmp.lt.s32.totalorder %s207_s16, %s207_s16 }
  0x11   :  { %230 = vmatprep.subr.mxu0 %v299_v0  ;;  %241 = vmatprep.subr.mxu1 %v299_v0  ;;  %v38_v10 = vld [vmem:[#allocation2] sm:$0xff]  ;;  %p275_p5 = scmp.ne.s32.totalorder %s207_s16, %s274_s3  ;;  %p280_p7 = scmp.lt.s32.totalorder %s274_s3, %s274_s3 }
  0x12   :  { %231 = vmatpush3.msra.mxu0 %v36_v2  ;;  %242 = vmatpush3.msra.mxu1 %v116_v7  ;;  %v216_v15 = vld [vmem:[%s374_s4] ss:$0 sm:$0xff] }
  0x13   :  { %232 = vmatprep.subr.mxu0 %v299_v0  ;;  %243 = vmatprep.subr.mxu1 %v299_v0  ;;  %p281_p8 = por %p280_p7, %p279_p6 }
  0x14   :  { %233 = vmatpush3.msra.mxu0 %v35_v4  ;;  %244 = vmatpush3.msra.mxu1 %v115_v8 }
  0x15   :  { %234 = vmatprep.subr.mxu0 %v299_v0  ;;  %245 = vmatprep.subr.mxu1 %v299_v0  ;;  %p282_p9 = pnand %p281_p8, %p275_p5 }
  0x16   :  { %235 = vmatpush3.msra.mxu0 %v34_v5  ;;  %246 = vmatpush3.msra.mxu1 %v114_v9 }
  0x17   :  { %237 = vmatmul.mubr.msk.f32.vlgmr.msra.gmra.mxu0 %vm39_vm1, %v33_v6 }
  0xd7   :  { %v109_v11 = vpop.f32.mrf.mxu0 }
  0xd8   :  { %v110_v12 = vadd.f32 %v109_v11, %v38_v10 }
  0xd9   :  { %v238_v13 = vpop.f32.mrf.mxu0 }
  0xda   :  { %v113_v14 = vmax.f32 %v110_v12, 0.0 }
  0xdc   :  { %248 = vmatmul.mubr.msk.f32.vlgmr.msra.gmra.mxu1 %vm39_vm1, %v113_v14 }
 0x19c   :  { %v194_v16 = vpop.f32.mrf.mxu1 }
 0x19d   :  { %v195_v17 = vadd.f32 %v216_v15, %v194_v16 }
 0x19e   :  { %v249_v18 = vpop.f32.mrf.mxu1 }
 0x19f   :  { %199 = vst.msk [vmem:[#allocation5] sm:$0xff] %vm198_vm2, %v195_v17 }
 0x1a0   :  { %285 = shalt.err (!%p282_p9)
}
 0x1a1   :  { %209 = dma.vmem_to_hbm [thread:$0]  %s207_s16, 128, %s375_s5, [#allocation4]  }
 0x1a2   :  { %296 = dma.done.wait [#allocation4], 128  }
 0x1a3   :  { %297 = vsyncadd [#allocation4], 4294967168 }
 0x1a4   :  { %213 = vsyncpa [#allocation3], 1 }
 0x1a5   :  { %214 = vsyncpa [#allocation4], 1 }

</bundles_post_ra>
